<compile_context>
chip_gen: v7x
topology: tpu7x:2x2x1
jax: 0.10.0
libtpu: 0.0.40
codegen_flags: <defaults>
</compile_context>

<pallas_src>
import functools

import jax
import jax.numpy as jnp
from jax import lax
from jax.experimental import pallas as pl
from jax.experimental.pallas import tpu as pltpu


def _round_up(x, m):
    return ((x + m - 1) // m) * m


def _vmem_capacity_bytes():
    try:
        return int(pltpu.get_tpu_info().vmem_capacity_bytes)
    except Exception:
        return 64 * 1024 * 1024   # conservative (v7x per-core) fallback


def gmm_small_kernel(x_ref,
                     w1_ref, b1_ref,
                     w2_ref, b2_ref,
                     w21_ref, b21_ref,
                     w22_ref, b22_ref,
                     w3d_ref, b3d_ref,
                     o_ref,
                     *, compute_dtype):
    """One batch tile.

    x arrives in natural [T, 16] layout.  Layer 1 contracts the feature axis
    of W1 against the feature axis of x, producing the transposed activation
    [32, T] directly, so the big batch dimension sits on the 128-wide lane
    axis for the whole network (dense vregs, lane-dense output stores).
    Matmul operands are `compute_dtype` (bf16 by default) with f32
    accumulation; bias + ReLU + softmax stay in f32.
    """
    x = x_ref[...].astype(compute_dtype)                       # [T, 16]

    # Layer 1: W1 @ x^T without materializing x^T in the wrapper.
    h = lax.dot_general(w1_ref[...], x,
                        dimension_numbers=(((1,), (1,)), ((), ())),
                        preferred_element_type=jnp.float32)    # [32, T]
    h = jnp.maximum(h + b1_ref[...], 0.0).astype(compute_dtype)

    def dense_relu(w_ref, b_ref, h):
        y = jnp.dot(w_ref[...], h, preferred_element_type=jnp.float32)
        return jnp.maximum(y + b_ref[...], 0.0).astype(compute_dtype)

    h = dense_relu(w2_ref, b2_ref, h)                          # [32, T]
    h = dense_relu(w21_ref, b21_ref, h)                        # [32, T]
    h = dense_relu(w22_ref, b22_ref, h)                        # [32, T]

    # 2-class softmax via the logit difference d = l1 - l0:
    #   p0 = 1/(1+e^d),  p1 = 1/(1+e^-d)
    # Two EUP sigmoids, no cross-lane reductions, no 1-p cancellation.
    # Kept in f32 so an overflowing e^d saturates correctly (p -> 0).
    d = (jnp.dot(w3d_ref[...], h, preferred_element_type=jnp.float32)
         + b3d_ref[...])                                       # [1, T]
    o_ref[0:1, :] = pl.reciprocal(1.0 + jnp.exp(d), approx=False).astype(o_ref.dtype)
    o_ref[1:2, :] = pl.reciprocal(1.0 + jnp.exp(-d), approx=False).astype(o_ref.dtype)


def gmm_small_forward(x, params, *, tile_b=None, use_bf16=True):
    """x: [B, 16] float32 -> [B, 2] float32 softmax probabilities."""
    (w1, b1, w2, b2, w21, b21, w22, b22, w3, b3) = params
    B = x.shape[0]
    compute_dtype = jnp.bfloat16 if use_bf16 else jnp.float32

    # Generation-aware batch tile: pick the biggest VMEM-legal tile, but keep
    # >= ~4 grid steps when the batch allows so both v7x TensorCores get work.
    if _vmem_capacity_bytes() >= 96 * 1024 * 1024:   # v5e / v6e: 128 MiB VMEM
        max_tb, vmem_limit = 65536, 80 * 1024 * 1024
    else:                                            # v7x: 64 MiB per core
        max_tb, vmem_limit = 32768, 48 * 1024 * 1024

    if tile_b is None:
        tile_b = _round_up(pl.cdiv(_round_up(B, 128), 4), 128)
    tb = max(128, min(max_tb, _round_up(int(tile_b), 128)))
    grid = (pl.cdiv(B, tb),)     # last block may be partial; Pallas masks it.

    # Fold the 2-logit softmax head into a single difference row.
    w3d = w3[1:2, :] - w3[0:1, :]                    # [1, 32]
    b3d = b3[1:2, :] - b3[0:1, :]                    # [1, 1]

    wc = lambda w: w.astype(compute_dtype)
    weights = (wc(w1), b1, wc(w2), b2, wc(w21), b21, wc(w22), b22,
               wc(w3d), b3d)

    # Weights/biases: full block, constant index_map -> DMA'd once, resident
    # in VMEM across all grid steps.
    const_spec = lambda a: pl.BlockSpec(a.shape, lambda i: (0, 0))

    out = pl.pallas_call(
        functools.partial(gmm_small_kernel, compute_dtype=compute_dtype),
        grid=grid,
        in_specs=[pl.BlockSpec((tb, 16), lambda i: (i, 0))]    # x, natural layout
                 + [const_spec(a) for a in weights],
        out_specs=pl.BlockSpec((2, tb), lambda i: (0, i)),     # lane-dense store
        out_shape=jax.ShapeDtypeStruct((2, B), jnp.float32),
        compiler_params=pltpu.CompilerParams(
            dimension_semantics=("parallel",),   # shard batch tiles across TCs
            vmem_limit_bytes=vmem_limit,
        ),
    )(x, *weights)

    # [2, B] -> [B, 2].  (An on-device consumer that accepts the [2, B] layout
    # can skip this transpose and save its HBM round trip.)
    return out.T


def init_params(key):
    """Deterministic init mimicking nn.Linear (weight [out, in], bias [out, 1])."""
    dims = [(16, 32), (32, 32), (32, 32), (32, 32), (32, 2)]
    params = []
    for fan_in, fan_out in dims:
        kw, kb, key = jax.random.split(key, 3)
        bound = 1.0 / (fan_in ** 0.5)
        w = jax.random.uniform(kw, (fan_out, fan_in), jnp.float32, -bound, bound)
        b = jax.random.uniform(kb, (fan_out, 1), jnp.float32, -bound, bound)
        params.extend([w, b])
    return tuple(params)


def reference_forward(x, params):
    (w1, b1, w2, b2, w21, b21, w22, b22, w3, b3) = params
    h = jax.nn.relu(x @ w1.T + b1[:, 0])
    h = jax.nn.relu(h @ w2.T + b2[:, 0])
    h = jax.nn.relu(h @ w21.T + b21[:, 0])
    h = jax.nn.relu(h @ w22.T + b22[:, 0])
    logits = h @ w3.T + b3[:, 0]
    return jax.nn.softmax(logits, axis=-1)


if __name__ == "__main__":
    key = jax.random.PRNGKey(0)
    kx, kx2, kp = jax.random.split(key, 3)

    params = init_params(kp)

    # Small demo batch (single grid step, partial block).
    B = 8
    x = jax.random.normal(kx, (B, 16), jnp.float32)
    ref = reference_forward(x, params)

    out = jax.block_until_ready(gmm_small_forward(x, params, use_bf16=False))
    assert out.shape == (B, 2)
    assert jnp.allclose(out, ref, atol=1e-5, rtol=1e-5)
    assert jnp.allclose(jnp.sum(out, axis=-1), 1.0, atol=1e-5)

    # Default bf16-matmul path (f32 accumulation) - looser tolerance.
    out_bf16 = jax.block_until_ready(gmm_small_forward(x, params))
    assert out_bf16.shape == (B, 2)
    assert jnp.allclose(out_bf16, ref, atol=2e-2)

    # Multi-tile batch with a ragged tail (grid > 1, partial final block).
    B2 = 300
    x2 = jax.random.normal(kx2, (B2, 16), jnp.float32)
    ref2 = reference_forward(x2, params)
    out2 = jax.block_until_ready(
        gmm_small_forward(x2, params, tile_b=128, use_bf16=False))
    assert out2.shape == (B2, 2)
    assert jnp.allclose(out2, ref2, atol=1e-5, rtol=1e-5)

    print("KERNEL_OK")
</pallas_src>

<mosaic_0001>
module attributes {stable_mosaic.version = 11 : i64} {
  func.func @gmm_small_kernel(%arg0: i32, %arg1: memref<128x16xf32, #tpu.memory_space<vmem>>, %arg2: memref<32x16xf32, #tpu.memory_space<vmem>>, %arg3: memref<32x1xf32, #tpu.memory_space<vmem>>, %arg4: memref<32x32xf32, #tpu.memory_space<vmem>>, %arg5: memref<32x1xf32, #tpu.memory_space<vmem>>, %arg6: memref<32x32xf32, #tpu.memory_space<vmem>>, %arg7: memref<32x1xf32, #tpu.memory_space<vmem>>, %arg8: memref<32x32xf32, #tpu.memory_space<vmem>>, %arg9: memref<32x1xf32, #tpu.memory_space<vmem>>, %arg10: memref<1x32xf32, #tpu.memory_space<vmem>>, %arg11: memref<1x1xf32, #tpu.memory_space<vmem>>, %arg12: memref<2x128xf32, #tpu.memory_space<vmem>>) attributes {dimension_semantics = [#tpu.dimension_semantics<parallel>], iteration_bounds = array<i64: 1>, scalar_prefetch = 0 : i64, scratch_operands = 0 : i64, tpu.core_type = #tpu.core_type<tc>, window_params = [{transform_indices = @transform_0, window_bounds = array<i64: 128, 16>}, {pipeline_mode = #tpu.pipeline_mode<synchronous>, transform_indices = @transform_1, window_bounds = array<i64: 32, 16>}, {pipeline_mode = #tpu.pipeline_mode<synchronous>, transform_indices = @transform_2, window_bounds = array<i64: 32, 1>}, {pipeline_mode = #tpu.pipeline_mode<synchronous>, transform_indices = @transform_3, window_bounds = array<i64: 32, 32>}, {pipeline_mode = #tpu.pipeline_mode<synchronous>, transform_indices = @transform_4, window_bounds = array<i64: 32, 1>}, {pipeline_mode = #tpu.pipeline_mode<synchronous>, transform_indices = @transform_5, window_bounds = array<i64: 32, 32>}, {pipeline_mode = #tpu.pipeline_mode<synchronous>, transform_indices = @transform_6, window_bounds = array<i64: 32, 1>}, {pipeline_mode = #tpu.pipeline_mode<synchronous>, transform_indices = @transform_7, window_bounds = array<i64: 32, 32>}, {pipeline_mode = #tpu.pipeline_mode<synchronous>, transform_indices = @transform_8, window_bounds = array<i64: 32, 1>}, {pipeline_mode = #tpu.pipeline_mode<synchronous>, transform_indices = @transform_9, window_bounds = array<i64: 1, 32>}, {pipeline_mode = #tpu.pipeline_mode<synchronous>, transform_indices = @transform_10, window_bounds = array<i64: 1, 1>}, {transform_indices = @transform_11, window_bounds = array<i64: 2, 128>}]} {
    %c0 = arith.constant 0 : index
    %c0_0 = arith.constant 0 : index
    %0 = vector.load %arg1[%c0, %c0_0] : memref<128x16xf32, #tpu.memory_space<vmem>>, vector<128x16xf32>
    %c0_1 = arith.constant 0 : index
    %c0_2 = arith.constant 0 : index
    %1 = vector.load %arg2[%c0_1, %c0_2] : memref<32x16xf32, #tpu.memory_space<vmem>>, vector<32x16xf32>
    %cst = arith.constant dense<0.000000e+00> : vector<32x128xf32>
    %2 = tpu.matmul %1, %0, %cst {dimension_numbers = #tpu.dot_dimension_numbers<[1], [1], [0], [0], [0, 0, 1, 0], [], []>} : vector<32x16xf32>, vector<128x16xf32>, vector<32x128xf32> -> vector<32x128xf32>
    %c0_3 = arith.constant 0 : index
    %c0_4 = arith.constant 0 : index
    %3 = vector.load %arg3[%c0_3, %c0_4] : memref<32x1xf32, #tpu.memory_space<vmem>>, vector<32x1xf32>
    %4 = vector.broadcast %3 : vector<32x1xf32> to vector<32x128xf32>
    %5 = arith.addf %2, %4 : vector<32x128xf32>
    %cst_5 = arith.constant 0.000000e+00 : f32
    %6 = vector.broadcast %cst_5 : f32 to vector<32x128xf32>
    %7 = arith.maximumf %5, %6 : vector<32x128xf32>
    %c0_6 = arith.constant 0 : index
    %c0_7 = arith.constant 0 : index
    %8 = vector.load %arg4[%c0_6, %c0_7] : memref<32x32xf32, #tpu.memory_space<vmem>>, vector<32x32xf32>
    %cst_8 = arith.constant dense<0.000000e+00> : vector<32x128xf32>
    %9 = tpu.matmul %8, %7, %cst_8 {dimension_numbers = #tpu.dot_dimension_numbers<[1], [0], [0], [1], [0, 0, 1, 1], [], []>} : vector<32x32xf32>, vector<32x128xf32>, vector<32x128xf32> -> vector<32x128xf32>
    %c0_9 = arith.constant 0 : index
    %c0_10 = arith.constant 0 : index
    %10 = vector.load %arg5[%c0_9, %c0_10] : memref<32x1xf32, #tpu.memory_space<vmem>>, vector<32x1xf32>
    %11 = vector.broadcast %10 : vector<32x1xf32> to vector<32x128xf32>
    %12 = arith.addf %9, %11 : vector<32x128xf32>
    %cst_11 = arith.constant 0.000000e+00 : f32
    %13 = vector.broadcast %cst_11 : f32 to vector<32x128xf32>
    %14 = arith.maximumf %12, %13 : vector<32x128xf32>
    %c0_12 = arith.constant 0 : index
    %c0_13 = arith.constant 0 : index
    %15 = vector.load %arg6[%c0_12, %c0_13] : memref<32x32xf32, #tpu.memory_space<vmem>>, vector<32x32xf32>
    %cst_14 = arith.constant dense<0.000000e+00> : vector<32x128xf32>
    %16 = tpu.matmul %15, %14, %cst_14 {dimension_numbers = #tpu.dot_dimension_numbers<[1], [0], [0], [1], [0, 0, 1, 1], [], []>} : vector<32x32xf32>, vector<32x128xf32>, vector<32x128xf32> -> vector<32x128xf32>
    %c0_15 = arith.constant 0 : index
    %c0_16 = arith.constant 0 : index
    %17 = vector.load %arg7[%c0_15, %c0_16] : memref<32x1xf32, #tpu.memory_space<vmem>>, vector<32x1xf32>
    %18 = vector.broadcast %17 : vector<32x1xf32> to vector<32x128xf32>
    %19 = arith.addf %16, %18 : vector<32x128xf32>
    %cst_17 = arith.constant 0.000000e+00 : f32
    %20 = vector.broadcast %cst_17 : f32 to vector<32x128xf32>
    %21 = arith.maximumf %19, %20 : vector<32x128xf32>
    %c0_18 = arith.constant 0 : index
    %c0_19 = arith.constant 0 : index
    %22 = vector.load %arg8[%c0_18, %c0_19] : memref<32x32xf32, #tpu.memory_space<vmem>>, vector<32x32xf32>
    %cst_20 = arith.constant dense<0.000000e+00> : vector<32x128xf32>
    %23 = tpu.matmul %22, %21, %cst_20 {dimension_numbers = #tpu.dot_dimension_numbers<[1], [0], [0], [1], [0, 0, 1, 1], [], []>} : vector<32x32xf32>, vector<32x128xf32>, vector<32x128xf32> -> vector<32x128xf32>
    %c0_21 = arith.constant 0 : index
    %c0_22 = arith.constant 0 : index
    %24 = vector.load %arg9[%c0_21, %c0_22] : memref<32x1xf32, #tpu.memory_space<vmem>>, vector<32x1xf32>
    %25 = vector.broadcast %24 : vector<32x1xf32> to vector<32x128xf32>
    %26 = arith.addf %23, %25 : vector<32x128xf32>
    %cst_23 = arith.constant 0.000000e+00 : f32
    %27 = vector.broadcast %cst_23 : f32 to vector<32x128xf32>
    %28 = arith.maximumf %26, %27 : vector<32x128xf32>
    %c0_24 = arith.constant 0 : index
    %c0_25 = arith.constant 0 : index
    %29 = vector.load %arg10[%c0_24, %c0_25] : memref<1x32xf32, #tpu.memory_space<vmem>>, vector<1x32xf32>
    %cst_26 = arith.constant dense<0.000000e+00> : vector<1x128xf32>
    %30 = tpu.matmul %29, %28, %cst_26 {dimension_numbers = #tpu.dot_dimension_numbers<[1], [0], [0], [1], [0, 0, 1, 1], [], []>} : vector<1x32xf32>, vector<32x128xf32>, vector<1x128xf32> -> vector<1x128xf32>
    %c0_27 = arith.constant 0 : index
    %c0_28 = arith.constant 0 : index
    %31 = vector.load %arg11[%c0_27, %c0_28] : memref<1x1xf32, #tpu.memory_space<vmem>>, vector<1x1xf32>
    %32 = vector.broadcast %31 : vector<1x1xf32> to vector<1x128xf32>
    %33 = arith.addf %30, %32 : vector<1x128xf32>
    %34 = math.exp %33 : vector<1x128xf32>
    %cst_29 = arith.constant 1.000000e+00 : f32
    %35 = vector.broadcast %cst_29 : f32 to vector<1x128xf32>
    %36 = arith.addf %35, %34 : vector<1x128xf32>
    %37 = tpu.reciprocal %36 : vector<1x128xf32> -> vector<1x128xf32>
    %c0_30 = arith.constant 0 : index
    %c0_31 = arith.constant 0 : index
    %38 = vector.load %arg12[%c0_30, %c0_31] : memref<2x128xf32, #tpu.memory_space<vmem>>, vector<1x128xf32>
    tpu.vector_store %arg12[%c0_30, %c0_31], %37 {strides = array<i32>} : memref<2x128xf32, #tpu.memory_space<vmem>>, vector<1x128xf32>,
    %cst_32 = arith.constant 0.000000e+00 : f32
    %39 = vector.broadcast %cst_32 : f32 to vector<1x128xf32>
    %40 = arith.subf %39, %33 : vector<1x128xf32>
    %41 = math.exp %40 : vector<1x128xf32>
    %cst_33 = arith.constant 1.000000e+00 : f32
    %42 = vector.broadcast %cst_33 : f32 to vector<1x128xf32>
    %43 = arith.addf %42, %41 : vector<1x128xf32>
    %44 = tpu.reciprocal %43 : vector<1x128xf32> -> vector<1x128xf32>
    %c1 = arith.constant 1 : index
    %c0_34 = arith.constant 0 : index
    %45 = vector.load %arg12[%c1, %c0_34] : memref<2x128xf32, #tpu.memory_space<vmem>>, vector<1x128xf32>
    tpu.vector_store %arg12[%c1, %c0_34], %44 {strides = array<i32>} : memref<2x128xf32, #tpu.memory_space<vmem>>, vector<1x128xf32>,
    return
  }
  func.func @transform_0(%arg0: i32) -> (i32, i32) {
    %c0_i32 = arith.constant 0 : i32
    %c0_i32_0 = arith.constant 0 : i32
    return %arg0, %c0_i32 : i32, i32
  }
  func.func @transform_1(%arg0: i32) -> (i32, i32) {
    %c0_i32 = arith.constant 0 : i32
    %c0_i32_0 = arith.constant 0 : i32
    %c0_i32_1 = arith.constant 0 : i32
    return %c0_i32, %c0_i32_0 : i32, i32
  }
  func.func @transform_2(%arg0: i32) -> (i32, i32) {
    %c0_i32 = arith.constant 0 : i32
    %c0_i32_0 = arith.constant 0 : i32
    %c0_i32_1 = arith.constant 0 : i32
    return %c0_i32, %c0_i32_0 : i32, i32
  }
  func.func @transform_3(%arg0: i32) -> (i32, i32) {
    %c0_i32 = arith.constant 0 : i32
    %c0_i32_0 = arith.constant 0 : i32
    %c0_i32_1 = arith.constant 0 : i32
    return %c0_i32, %c0_i32_0 : i32, i32
  }
  func.func @transform_4(%arg0: i32) -> (i32, i32) {
    %c0_i32 = arith.constant 0 : i32
    %c0_i32_0 = arith.constant 0 : i32
    %c0_i32_1 = arith.constant 0 : i32
    return %c0_i32, %c0_i32_0 : i32, i32
  }
  func.func @transform_5(%arg0: i32) -> (i32, i32) {
    %c0_i32 = arith.constant 0 : i32
    %c0_i32_0 = arith.constant 0 : i32
    %c0_i32_1 = arith.constant 0 : i32
    return %c0_i32, %c0_i32_0 : i32, i32
  }
  func.func @transform_6(%arg0: i32) -> (i32, i32) {
    %c0_i32 = arith.constant 0 : i32
    %c0_i32_0 = arith.constant 0 : i32
    %c0_i32_1 = arith.constant 0 : i32
    return %c0_i32, %c0_i32_0 : i32, i32
  }
  func.func @transform_7(%arg0: i32) -> (i32, i32) {
    %c0_i32 = arith.constant 0 : i32
    %c0_i32_0 = arith.constant 0 : i32
    %c0_i32_1 = arith.constant 0 : i32
    return %c0_i32, %c0_i32_0 : i32, i32
  }
  func.func @transform_8(%arg0: i32) -> (i32, i32) {
    %c0_i32 = arith.constant 0 : i32
    %c0_i32_0 = arith.constant 0 : i32
    %c0_i32_1 = arith.constant 0 : i32
    return %c0_i32, %c0_i32_0 : i32, i32
  }
  func.func @transform_9(%arg0: i32) -> (i32, i32) {
    %c0_i32 = arith.constant 0 : i32
    %c0_i32_0 = arith.constant 0 : i32
    %c0_i32_1 = arith.constant 0 : i32
    return %c0_i32, %c0_i32_0 : i32, i32
  }
  func.func @transform_10(%arg0: i32) -> (i32, i32) {
    %c0_i32 = arith.constant 0 : i32
    %c0_i32_0 = arith.constant 0 : i32
    %c0_i32_1 = arith.constant 0 : i32
    return %c0_i32, %c0_i32_0 : i32, i32
  }
  func.func @transform_11(%arg0: i32) -> (i32, i32) {
    %c0_i32 = arith.constant 0 : i32
    %c0_i32_0 = arith.constant 0 : i32
    return %c0_i32, %arg0 : i32, i32
  }
}

</mosaic_0001>

<bundles_post_ra>
// kernel: tpu_custom_call.1
= control target key start
LH: loop header
LB: loop body
LE: loop exit
PB: predicated region body
PF: predicated region fallthrough
CT: control target
= control target key end

     0   :  { %s1304_s0 = inlined_call_operand.vmem [shape: f32[8,16], index: 0, kind: input, shape index: {}]   ;;  %s1305_s1 = inlined_call_operand.vmem [shape: f32[32,16], index: 1, kind: input, shape index: {}]   ;;  %s1306_s2 = inlined_call_operand.vmem [shape: f32[32,1], index: 2, kind: input, shape index: {}]   ;;  %s1307_s3 = inlined_call_operand.vmem [shape: f32[32,32], index: 3, kind: input, shape index: {}]   ;;  %s1308_s4 = inlined_call_operand.vmem [shape: f32[32,1], index: 4, kind: input, shape index: {}]   ;;  %s1309_s5 = inlined_call_operand.vmem [shape: f32[32,32], index: 5, kind: input, shape index: {}]   ;;  %s1310_s6 = inlined_call_operand.vmem [shape: f32[32,1], index: 6, kind: input, shape index: {}]   ;;  %s1311_s7 = inlined_call_operand.vmem [shape: f32[32,32], index: 7, kind: input, shape index: {}]   ;;  %s1312_s8 = inlined_call_operand.vmem [shape: f32[32,1], index: 8, kind: input, shape index: {}]   ;;  %s1313_s9 = inlined_call_operand.vmem [shape: f32[1,32], index: 9, kind: input, shape index: {}]   ;;  %s1314_s10 = inlined_call_operand.<no memory space> [shape: f32[1,1], index: 10, kind: input, shape index: {}]   ;;  %s1315_s11 = inlined_call_operand.hbm [shape: f32[2,8], index: 11, kind: output, shape index: {}]  }
   0x1   :  { %v16_v0 = vstv %s1314_s10 }
   0x2   :  { %17 = vst [vmem:[#allocation2] sm:$0x1] %v16_v0 }
   0x3   :  { %v41_v1 = vld [vmem:[%s1304_s0] sm:$0xff]  ;;  %v42_v2 = vld [vmem:[%s1304_s0 + $0x8] sm:$0xff]  ;;  %vm85_vm0 = vcmask 130048   ;;  %v43_v3 = vld [vmem:[%s1304_s0 + $0x10] sm:$0xff]  ;;  %v1022_v7 = vmov 0  }
   0x4   :  { %v905_v4 = vpack.c.bf16 %v42_v2, %v41_v1  ;;  %vm1101_vm1 = vmpackc.low %vm85_vm0, %vm85_vm0  ;;  %v44_v6 = vld [vmem:[%s1304_s0 + $0x18] sm:$0xff]  ;;  %988 = vset.pattern.permute.xlu0 %v1022_v7  ;;  %989 = vset.pattern.permute.xlu1 %v1022_v7  ;;  %v57_v9 = vld [vmem:[%s1305_s1] sm:$0xff] }
   0x5   :  { %v911_v8 = vpack.c.bf16 %v44_v6, %v43_v3  ;;  %v45_v10 = vld [vmem:[%s1304_s0 + $0x20] sm:$0xff]  ;;  %v46_v11 = vld [vmem:[%s1304_s0 + $0x28] sm:$0xff]  ;;  %846 = vmatprep.mubr.msk.f32.mxu0 %vm85_vm0, %v57_v9  ;;  %v63_v13 = vld [vmem:[%s1306_s2 + $0x10] sm:$0xff] }
   0x6   :  { %907 = vmatprep.subr.msk.bf16.mxu0 %vm1101_vm1, %v905_v4  ;;  %v61_v12 = vld [vmem:[%s1306_s2] sm:$0xff]  ;;  %77 = vperm.xlu1 %989, %v63_v13   ;;  %v917_v14 = vpack.c.bf16 %v46_v11, %v45_v10  ;;  %v62_v15 = vld [vmem:[%s1306_s2 + $0x8] sm:$0xff]  ;;  %v64_v16 = vld [vmem:[%s1306_s2 + $0x18] sm:$0xff] }
   0x7   :  { %910 = vmatpush3.bf16.xpose.msk.msra.mxu0 %vm1101_vm1, %v905_v4  ;;  %67 = vperm.xlu0 %988, %v61_v12  }
   0x8   :  { %913 = vmatprep.subr.msk.bf16.mxu0 %vm1101_vm1, %v911_v8 }
   0xb   :  { %72 = vperm.xlu0 %988, %v62_v15  }
   0xf   :  { %916 = vmatpush3.bf16.xpose.msk.msra.mxu0 %vm1101_vm1, %v911_v8 }
  0x10   :  { %18 = vsyncpa [#allocation4], 0  ;;  %919 = vmatprep.subr.msk.bf16.mxu0 %vm1101_vm1, %v917_v14  ;;  %v239_v17 = vld [vmem:[%s1308_s4] sm:$0xff]  ;;  %82 = vperm.xlu1 %989, %v64_v16   ;;  %v47_v18 = vld [vmem:[%s1304_s0 + $0x30] sm:$0xff]  ;;  %vm263_vm2 = vcmask 261120   ;;  %vm1024_vm3 = vmmov 0  }
  0x11   :  { %v48_v19 = vld [vmem:[%s1304_s0 + $0x38] sm:$0xff]  ;;  %v240_v20 = vld [vmem:[%s1308_s4 + $0x8] sm:$0xff]  ;;  %245 = vperm.xlu0 %988, %v239_v17   ;;  %v241_v22 = vld [vmem:[%s1308_s4 + $0x10] sm:$0xff] }
  0x12   :  { %v923_v21 = vpack.c.bf16 %v48_v19, %v47_v18  ;;  %v242_v23 = vld [vmem:[%s1308_s4 + $0x18] sm:$0xff]  ;;  %v369_v24 = vld [vmem:[%s1310_s6] sm:$0xff]  ;;  %v50_v26 = vld [vmem:[%s1304_s0 + $0x48] sm:$0xff] }
  0x13   :  { %v49_v25 = vld [vmem:[%s1304_s0 + $0x40] sm:$0xff]  ;;  %v370_v27 = vld [vmem:[%s1310_s6 + $0x8] sm:$0xff]  ;;  %v371_v29 = vld [vmem:[%s1310_s6 + $0x10] sm:$0xff] }
  0x14   :  { %250 = vperm.xlu1 %989, %v240_v20   ;;  %v929_v28 = vpack.c.bf16 %v50_v26, %v49_v25  ;;  %v372_v30 = vld [vmem:[%s1310_s6 + $0x18] sm:$0xff]  ;;  %v498_v31 = vld [vmem:[%s1312_s8] sm:$0xff]  ;;  %v51_v32 = vld [vmem:[%s1304_s0 + $0x50] sm:$0xff] }
  0x15   :  { %255 = vperm.xlu0 %988, %v241_v22   ;;  %v52_v33 = vld [vmem:[%s1304_s0 + $0x58] sm:$0xff]  ;;  %v499_v34 = vld [vmem:[%s1312_s8 + $0x8] sm:$0xff]  ;;  %v500_v36 = vld [vmem:[%s1312_s8 + $0x10] sm:$0xff] }
  0x16   :  { %v935_v35 = vpack.c.bf16 %v52_v33, %v51_v32  ;;  %v501_v37 = vld [vmem:[%s1312_s8 + $0x18] sm:$0xff]  ;;  %v624_v38 = vld [vmem:[#allocation2] sm:$0x1]  ;;  %v54_v40 = vld [vmem:[%s1304_s0 + $0x68] sm:$0xff] }
  0x17   :  { %922 = vmatpush3.bf16.xpose.msk.msra.mxu0 %vm1101_vm1, %v917_v14  ;;  %v53_v39 = vld [vmem:[%s1304_s0 + $0x60] sm:$0xff]  ;;  %v55_v42 = vld [vmem:[%s1304_s0 + $0x70] sm:$0xff]  ;;  %v56_v43 = vld [vmem:[%s1304_s0 + $0x78] sm:$0xff] }
  0x18   :  { %925 = vmatprep.subr.msk.bf16.mxu0 %vm1101_vm1, %v923_v21  ;;  %260 = vperm.xlu1 %989, %v242_v23   ;;  %v941_v41 = vpack.c.bf16 %v54_v40, %v53_v39  ;;  %v947_v44 = vpack.c.bf16 %v56_v43, %v55_v42  ;;  %v58_v45 = vld [vmem:[%s1305_s1 + $0x8] sm:$0xff]  ;;  %v59_v46 = vld [vmem:[%s1305_s1 + $0x10] sm:$0xff]  ;;  %v60_v47 = vld [vmem:[%s1305_s1 + $0x18] sm:$0xff] }
  0x19   :  { %375 = vperm.xlu0 %988, %v369_v24   ;;  %v235_v48 = vld [vmem:[%s1307_s3] sm:$0xff]  ;;  %v236_v3 = vld [vmem:[%s1307_s3 + $0x8] sm:$0xff]  ;;  %v237_v4 = vld [vmem:[%s1307_s3 + $0x10] sm:$0xff] }
  0x1a   :  { %860 = vmatprep.mubr.msk.f32.mxu1 %vm263_vm2, %v235_v48  ;;  %v238_v5 = vld [vmem:[%s1307_s3 + $0x18] sm:$0xff]  ;;  %v365_v6 = vld [vmem:[%s1309_s5] sm:$0xff]  ;;  %v366_v25 = vld [vmem:[%s1309_s5 + $0x8] sm:$0xff] }
  0x1b   :  { %v367_v26 = vld [vmem:[%s1309_s5 + $0x10] sm:$0xff] }
  0x1c   :  { %380 = vperm.xlu1 %989, %v370_v27   ;;  %v368_v27 = vld [vmem:[%s1309_s5 + $0x18] sm:$0xff]  ;;  %v496_v48 = vld [vmem:[%s1311_s7 + $0x10] sm:$0xff] }
  0x1d   :  { %385 = vperm.xlu0 %988, %v371_v29  }
  0x1f   :  { %928 = vmatpush3.bf16.xpose.msk.msra.mxu0 %vm1101_vm1, %v923_v21 }
  0x20   :  { %931 = vmatprep.subr.msk.bf16.mxu0 %vm1101_vm1, %v929_v28  ;;  %390 = vperm.xlu1 %989, %v372_v30  }
  0x21   :  { %504 = vperm.xlu0 %988, %v498_v31  }
  0x24   :  { %509 = vperm.xlu1 %989, %v499_v34  }
  0x25   :  { %514 = vperm.xlu0 %988, %v500_v36  }
  0x27   :  { %934 = vmatpush3.bf16.xpose.msk.msra.mxu0 %vm1101_vm1, %v929_v28  ;;  %v494_v28 = vld [vmem:[%s1311_s7] sm:$0xff] }
  0x28   :  { %937 = vmatprep.subr.msk.bf16.mxu0 %vm1101_vm1, %v935_v35  ;;  %519 = vperm.xlu1 %989, %v501_v37  }
  0x29   :  { %627 = vperm.xlu0 %988, %v624_v38  }
  0x2f   :  { %940 = vmatpush3.bf16.xpose.msk.msra.mxu0 %vm1101_vm1, %v935_v35 }
  0x30   :  { %943 = vmatprep.subr.msk.bf16.mxu0 %vm1101_vm1, %v941_v41 }
  0x37   :  { %946 = vmatpush3.bf16.xpose.msk.msra.mxu0 %vm1101_vm1, %v941_v41 }
  0x38   :  { %949 = vmatprep.subr.msk.bf16.mxu0 %vm1101_vm1, %v947_v44 }
  0x3f   :  { %952 = vmatpush3.bf16.xpose.msk.msra.mxu0 %vm1101_vm1, %v947_v44 }
  0x46   :  { %847 = vmatmul.mubr.msk.f32.vlgmr.msra.gmra.mrb[0].mxu0 %vm85_vm0, %v58_v45 }
  0x47   :  { %849 = vmatprep.mubr.msk.f32.mxu0 %vm85_vm0, %v59_v46 }
  0x4a   :  { %850 = vmatmul.mubr.msk.f32.gmra.mrb[2].mxu0 %vm85_vm0, %v60_v47  ;;  %v495_v47 = vld [vmem:[%s1311_s7 + $0x8] sm:$0xff] }
  0x85   :  { %v78_v50 = vpop.permute.xlu1 %77 }
  0x86   :  { %v68_v49 = vpop.permute.xlu0 %67 }
  0x8a   :  { %v73_v51 = vpop.permute.xlu0 %72 }
  0x8f   :  { %v83_v57 = vpop.permute.xlu1 %82 }
  0x90   :  { %v246_v8 = vpop.permute.xlu0 %245 }
  0x93   :  { %v251_v7 = vpop.permute.xlu1 %250 }
  0x94   :  { %v256_v17 = vpop.permute.xlu0 %255 }
  0x97   :  { %v261_v14 = vpop.permute.xlu1 %260 }
  0x98   :  { %v376_v30 = vpop.permute.xlu0 %375 }
  0x9b   :  { %v381_v29 = vpop.permute.xlu1 %380 }
  0x9c   :  { %v386_v39 = vpop.permute.xlu0 %385 }
  0x9f   :  { %v391_v36 = vpop.permute.xlu1 %390 }
 0x119   :  { %v848_v52 = vpop.f32.mrb[0].mxu0 }
 0x11a   :  { %v218_v53 = vadd.f32 %v848_v52, %v73_v51  ;;  %v212_v54 = vpop.f32.mrb[1].mxu0  ;;  %v1025_v51 = vmov 0.0   ;;  %v510_v52 = vpop.permute.xlu1 %509 }
 0x11b   :  { %v213_v55 = vadd.f32 %v212_v54, %v68_v49  ;;  %v497_v49 = vld [vmem:[%s1311_s7 + $0x18] sm:$0xff] }
 0x11c   :  { %v232_v56 = vmax.f32 %v218_v53, 0.0  ;;  %v505_v53 = vpop.permute.xlu0 %504 }
 0x11d   :  { %v231_v58 = vmax.f32 %v213_v55, 0.0  ;;  %v851_v59 = vpop.f32.mrb[2].mxu0 }
 0x11e   :  { %v228_v60 = vadd.f32 %v851_v59, %v83_v57  ;;  %v222_v61 = vpop.f32.mrb[3].mxu0  ;;  %v520_v59 = vpop.permute.xlu1 %519 }
 0x11f   :  { %v223_v62 = vadd.f32 %v222_v61, %v78_v50  ;;  %v953_v63 = vpack.c.bf16 %v232_v56, %v231_v58  ;;  %v1023_v50 = vmov 0.0|0.0  }
 0x120   :  { %v234_v0 = vmax.f32 %v228_v60, 0.0 }
 0x121   :  { %v233_v1 = vmax.f32 %v223_v62, 0.0  ;;  %954 = vmatprep.subr.bf16.mxu1 %v953_v63  ;;  %v515_v62 = vpop.permute.xlu0 %514 }
 0x122   :  { %956 = vmatpush3.bf16.msra.mxu1 %v953_v63 }
 0x123   :  { %v957_v2 = vpack.c.bf16 %v234_v0, %v233_v1 }
 0x125   :  { %958 = vmatprep.subr.bf16.mxu1 %v957_v2 }
 0x126   :  { %960 = vmatpush3.bf16.msra.mxu1 %v957_v2 }
 0x129   :  { %861 = vmatmul.mubr.msk.f32.vlgmr.msra.gmra.mrb[0].mxu1 %vm263_vm2, %v236_v3 }
 0x12a   :  { %863 = vmatprep.mubr.msk.f32.mxu1 %vm263_vm2, %v237_v4 }
 0x12d   :  { %864 = vmatmul.mubr.msk.f32.gmra.mrb[2].mxu1 %vm263_vm2, %v238_v5 }
 0x12e   :  { %874 = vmatprep.mubr.msk.f32.mxu1 %vm263_vm2, %v365_v6  ;;  %v623_v6 = vld [vmem:[%s1313_s9] sm:$0x1]  ;;  %s1026_s9 = smov [#allocation3]  }
 0x12f   :  { %s724_s22 = sshll.u32 %s1026_s9, 4  ;;  %s725_s22 = int_to_ptr.vmem [resolvable:$true] %s724_s22 }
 0x130   :  { %s998_s0 = scalar_lea.vmem %s725_s22, 32  ;;  %p1003_p1 = scmp.lt.s32.totalorder %s725_s22, %s725_s22 }
 0x131   :  { %p999_p0 = scmp.ne.s32.totalorder %s725_s22, %s998_s0  ;;  %p1004_p2 = scmp.lt.s32.totalorder %s998_s0, %s998_s0 }
 0x133   :  { %p1005_p3 = por %p1004_p2, %p1003_p1 }
 0x135   :  { %p1006_p4 = pnand %p1005_p3, %p999_p0 }
 0x1fc   :  { %v862_v9 = vpop.f32.mrb[0].mxu1 }
 0x1fd   :  { %v348_v10 = vadd.f32 %v862_v9, %v251_v7  ;;  %v342_v11 = vpop.f32.mrb[1].mxu1  ;;  %v630_v7 = vlaneseq }
 0x1fe   :  { %v343_v12 = vadd.f32 %v342_v11, %v246_v8 }
 0x1ff   :  { %v362_v13 = vmax.f32 %v348_v10, 0.0  ;;  %v631_v8 = vshrl.u32 %v630_v7, 7  ;;  %v628_v10 = vpop.permute.xlu0 %627 }
 0x200   :  { %v361_v15 = vmax.f32 %v343_v12, 0.0  ;;  %v865_v16 = vpop.f32.mrb[2].mxu1 }
 0x201   :  { %v358_v18 = vadd.f32 %v865_v16, %v261_v14  ;;  %v352_v19 = vpop.f32.mrb[3].mxu1  ;;  %v632_v9 = vsub.s32 0, %v631_v8 }
 0x202   :  { %v961_v20 = vpack.c.bf16 %v362_v13, %v361_v15  ;;  %v353_v21 = vadd.f32 %v352_v19, %v256_v17 }
 0x203   :  { %v364_v22 = vmax.f32 %v358_v18, 0.0  ;;  %v633_v11 = vrot.slane %v628_v10, %v632_v9 }
 0x204   :  { %v363_v23 = vmax.f32 %v353_v21, 0.0  ;;  %962 = vmatprep.subr.bf16.mxu1 %v961_v20 }
 0x205   :  { %964 = vmatpush3.bf16.msra.mxu1 %v961_v20 }
 0x206   :  { %v965_v24 = vpack.c.bf16 %v364_v22, %v363_v23 }
 0x208   :  { %966 = vmatprep.subr.bf16.mxu1 %v965_v24 }
 0x209   :  { %968 = vmatpush3.bf16.msra.mxu1 %v965_v24 }
 0x20c   :  { %875 = vmatmul.mubr.msk.f32.vlgmr.msra.gmra.mrb[4].mxu1 %vm263_vm2, %v366_v25 }
 0x20d   :  { %877 = vmatprep.mubr.msk.f32.mxu1 %vm263_vm2, %v367_v26 }
 0x210   :  { %878 = vmatmul.mubr.msk.f32.gmra.mrb[6].mxu1 %vm263_vm2, %v368_v27 }
 0x211   :  { %888 = vmatprep.mubr.msk.f32.mxu1 %vm263_vm2, %v494_v28 }
 0x2df   :  { %v876_v31 = vpop.f32.mrb[4].mxu1 }
 0x2e0   :  { %v477_v32 = vadd.f32 %v876_v31, %v381_v29  ;;  %v471_v33 = vpop.f32.mrb[5].mxu1 }
 0x2e1   :  { %v472_v34 = vadd.f32 %v471_v33, %v376_v30 }
 0x2e2   :  { %v491_v35 = vmax.f32 %v477_v32, 0.0 }
 0x2e3   :  { %v490_v37 = vmax.f32 %v472_v34, 0.0  ;;  %v879_v38 = vpop.f32.mrb[6].mxu1 }
 0x2e4   :  { %v487_v40 = vadd.f32 %v879_v38, %v391_v36  ;;  %v481_v41 = vpop.f32.mrb[7].mxu1 }
 0x2e5   :  { %v969_v42 = vpack.c.bf16 %v491_v35, %v490_v37  ;;  %v482_v43 = vadd.f32 %v481_v41, %v386_v39 }
 0x2e6   :  { %v493_v44 = vmax.f32 %v487_v40, 0.0 }
 0x2e7   :  { %v492_v45 = vmax.f32 %v482_v43, 0.0  ;;  %970 = vmatprep.subr.bf16.mxu1 %v969_v42 }
 0x2e8   :  { %972 = vmatpush3.bf16.msra.mxu1 %v969_v42 }
 0x2e9   :  { %v973_v46 = vpack.c.bf16 %v493_v44, %v492_v45 }
 0x2eb   :  { %974 = vmatprep.subr.bf16.mxu1 %v973_v46 }
 0x2ec   :  { %976 = vmatpush3.bf16.msra.mxu1 %v973_v46 }
 0x2ed   :  { %977 = vmatprep.subr.bf16.mxu1 %v1023_v50 }
 0x2ef   :  { %889 = vmatmul.mubr.msk.f32.vlgmr.msra.gmra.mrb[8].mxu1 %vm263_vm2, %v495_v47 }
 0x2f0   :  { %891 = vmatprep.mubr.msk.f32.mxu1 %vm263_vm2, %v496_v48 }
 0x2f3   :  { %892 = vmatmul.mubr.msk.f32.gmra.mrb[10].mxu1 %vm263_vm2, %v497_v49 }
 0x2f4   :  { %902 = vmatprep.mubr.msk.f32.mxu1 %vm1024_vm3, %v1025_v51 }
 0x3c2   :  { %v890_v54 = vpop.f32.mrb[8].mxu1 }
 0x3c3   :  { %v606_v55 = vadd.f32 %v890_v54, %v510_v52  ;;  %v600_v56 = vpop.f32.mrb[9].mxu1 }
 0x3c4   :  { %v601_v57 = vadd.f32 %v600_v56, %v505_v53 }
 0x3c5   :  { %v620_v58 = vmax.f32 %v606_v55, 0.0 }
 0x3c6   :  { %v619_v60 = vmax.f32 %v601_v57, 0.0  ;;  %v893_v61 = vpop.f32.mrb[10].mxu1 }
 0x3c7   :  { %v616_v63 = vadd.f32 %v893_v61, %v520_v59  ;;  %v610_v0 = vpop.f32.mrb[11].mxu1 }
 0x3c8   :  { %v978_v1 = vpack.c.bf16 %v620_v58, %v619_v60  ;;  %v611_v2 = vadd.f32 %v610_v0, %v515_v62 }
 0x3c9   :  { %v622_v3 = vmax.f32 %v616_v63, 0.0 }
 0x3ca   :  { %v621_v4 = vmax.f32 %v611_v2, 0.0  ;;  %979 = vmatpush3.bf16.msra.mxu1 %v978_v1 }
 0x3cb   :  { %980 = vmatprep.subr.bf16.mxu1 %v1023_v50 }
 0x3cc   :  { %v981_v5 = vpack.c.bf16 %v622_v3, %v621_v4 }
 0x3ce   :  { %982 = vmatpush3.bf16.msra.mxu1 %v981_v5 }
 0x3d1   :  { %903 = vmatmul.mubr.msk.f32.vlgmr.msra.gmra.mrb[12].mxu1 %vm263_vm2, %v623_v6 }
 0x4a4   :  { %v703_v12 = vpop.f32.mrb[12].mxu1 }
 0x4a5   :  { %v704_v13 = vadd.f32 %v703_v12, %v633_v11  ;;  %v904_v14 = vpop.f32.mrb[13].mxu1 }
 0x4a7   :  { %v707_v15 = vmul.f32 1.442695, %v704_v13  ;;  %v712_v16 = vsub.f32 0.0, %v704_v13 }
 0x4a9   :  { %990 = vpow2.f32 %v707_v15  ;;  %v713_v17 = vmul.f32 1.442695, %v712_v16 }
 0x4ab   :  { %992 = vpow2.f32 %v713_v17 }
 0x4b3   :  { %v991_v18 = vpop.eup %990 }
 0x4b4   :  { %v709_v19 = vadd.f32 1.0, %v991_v18 }
 0x4b5   :  { %v993_v20 = vpop.eup %992 }
 0x4b6   :  { %v715_v21 = vadd.f32 1.0, %v993_v20  ;;  %994 = vrcp.f32 %v709_v19 }
 0x4b8   :  { %996 = vrcp.f32 %v715_v21 }
 0x4c0   :  { %v995_v22 = vpop.eup %994 }
 0x4c1   :  { %711 = vst [vmem:[#allocation3] sm:$0x1] %v995_v22 }
 0x4c2   :  { %v997_v23 = vpop.eup %996 }
 0x4c3   :  { %717 = vst [vmem:[#allocation3 + $0x1] sm:$0x1] %v997_v23 }
 0x4c4   :  { %1009 = shalt.err (!%p1006_p4)
}
 0x4c5   :  { %s1010_s10 = scalar_lea.hbm %s1315_s11, 32 }
 0x4c6   :  { %p1011_p5 = scmp.ne.s32.totalorder %s1315_s11, %s1010_s10  ;;  %p1014_p6 = scmp.lt.u32.totalorder %s1010_s10, %s1315_s11 }
 0x4c8   :  { %p1016_p7 = pnand %p1014_p6, %p1011_p5 }
 0x4ca   :  { %1019 = shalt.err (!%p1016_p7)
}
 0x4cb   :  { %727 = dma.vmem_to_hbm [thread:$0]  %s725_s22, 32, %s1315_s11, [#allocation4]  }
 0x4cc   :  { %1020 = dma.done.wait [#allocation4], 32  }
 0x4cd   :  { %1021 = vsyncadd [#allocation4], 4294967264 }
 0x4ce   :  { %731 = vsyncpa [#allocation4], 1 }

</bundles_post_ra>
